<compile_context>
chip_gen: v7x
topology: tpu7x:2x2x1
jax: 0.10.0
libtpu: 0.0.40
codegen_flags: <defaults>
</compile_context>

<pallas_src>
import jax
import jax.numpy as jnp
from jax import lax
from jax.experimental import pallas as pl
from jax.experimental.pallas import tpu as pltpu

# dot_general dimension numbers for A @ B^T (contract last dim of both operands).
_NT_DIMS = (((1,), (1,)), ((), ()))

_TARGET_TILE_BYTES = 4 << 20    # ~4 MiB of x HBM traffic per grid step
_VMEM_BUDGET_BYTES = 24 << 20   # conservative: fits v7x (64 MiB physical) w/ headroom


def _round_up(n, m):
    return ((n + m - 1) // m) * m


def _mlp_kernel(x_ref, w1_ref, b1_ref, w2_ref, b2_ref, w3_ref, b3_ref, o_ref):
    # x_ref: (tb, d_in); weights in torch [out, in] layout; biases as [out, 1].
    x = x_ref[...]

    # Layer 1: h1^T = W1 @ x^T (NT dot_general, no materialized transpose),
    # + bias column, ReLU.  Result (64, tb) -- batch on the lane axis.
    h1 = lax.dot_general(w1_ref[...], x, _NT_DIMS,
                         preferred_element_type=jnp.float32) + b1_ref[...]
    h1 = jnp.maximum(h1, 0.0)                       # Dropout = identity (eval)

    # Layer 2: h2^T = W2 @ h1^T, bias, ReLU.  Result (32, tb).
    h2 = jnp.dot(w2_ref[...], h1,
                 preferred_element_type=jnp.float32) + b2_ref[...]
    h2 = jnp.maximum(h2, 0.0)                       # Dropout = identity (eval)

    # Layer 3: logits^T = W3 @ h2^T + b3  ->  lane-dense (1, tb) row, sigmoid (EUP).
    logits = jnp.dot(w3_ref[...], h2,
                     preferred_element_type=jnp.float32) + b3_ref[...]
    o_ref[...] = jax.nn.sigmoid(logits).astype(o_ref.dtype)


def _choose_tb(B, d_in, itemsize):
    """Batch tile: ~4 MiB of x per step, capped by lane-padded VMEM budget."""
    d_pad = _round_up(d_in, 128)
    tb = _TARGET_TILE_BYTES // (itemsize * d_pad)
    # VMEM per row of tb: x double-buffer (lane padded) + f32 h1/h2 + out row.
    bytes_per_row = 2 * d_pad * itemsize + (64 + 32) * 4 + 2 * 8 * 4
    tb = min(tb, _VMEM_BUDGET_BYTES // bytes_per_row)
    tb = max(tb, 1024)                   # floor per review
    tb = min(tb, _round_up(B, 128))      # never larger than the (128-rounded) batch
    return max(128, (tb // 128) * 128)


def _vmem_limit_bytes(tb, d_in, itemsize):
    """Explicit scoped-VMEM request matching the footprint + headroom."""
    d_pad = _round_up(d_in, 128)
    x_bytes = 2 * tb * d_pad * itemsize                 # double-buffered x tile
    act_bytes = (64 + 32 + 8) * tb * 4                  # h1, h2, logits (f32)
    out_bytes = 2 * 8 * tb * 4                          # double-buffered (1,tb) out
    w_bytes = 2 * (64 + 64 + 32 + 32 + 8 + 8) * d_pad * 4  # resident weights (tiny)
    need = x_bytes + act_bytes + out_bytes + w_bytes + (4 << 20)
    return int(min(need, 56 << 20))      # stay well under v7x's 64 MiB physical


def _batch_dim_semantics(n_tiles):
    """CORE_PARALLEL on v7x (2 TensorCores/chip), plain 'parallel' otherwise."""
    kind = ""
    try:
        kind = jax.devices()[0].device_kind.lower()
    except Exception:
        pass
    if n_tiles >= 2 and "7" in kind:
        return (pltpu.CORE_PARALLEL,)
    return ("parallel",)


def plain_mlp_forward(x, params, *, tb=None):
    """Fused forward pass. x: [B, d_in] float32 -> [B, 1] float32."""
    w1, b1, w2, b2, w3, b3 = params
    B, d_in = x.shape
    itemsize = jnp.dtype(x.dtype).itemsize

    if tb is None:
        tb = _choose_tb(B, d_in, itemsize)
    else:
        tb = max(128, _round_up(min(tb, _round_up(B, 128)), 128))

    # Ragged last block handled by Pallas (clipped reads/writes) -- no jnp.pad
    # copy of x in HBM.
    n_tiles = pl.cdiv(B, tb)

    in_specs = [
        pl.BlockSpec((tb, d_in), lambda i: (i, 0)),   # x tile (only tiled input)
        pl.BlockSpec(w1.shape, lambda i: (0, 0)),     # w1 (64, d_in)  -- resident
        pl.BlockSpec(b1.shape, lambda i: (0, 0)),     # b1 (64, 1)
        pl.BlockSpec(w2.shape, lambda i: (0, 0)),     # w2 (32, 64)
        pl.BlockSpec(b2.shape, lambda i: (0, 0)),     # b2 (32, 1)
        pl.BlockSpec(w3.shape, lambda i: (0, 0)),     # w3 (1, 32)
        pl.BlockSpec(b3.shape, lambda i: (0, 0)),     # b3 (1, 1)
    ]
    # Output is a single (1, B) row: all-but-last-block stores are dense 128-lane.
    out_spec = pl.BlockSpec((1, tb), lambda i: (0, i))

    weight_bytes = sum(int(a.size) * jnp.dtype(a.dtype).itemsize
                       for a in (w1, b1, w2, b2, w3, b3))
    cost = pl.CostEstimate(
        flops=2 * B * (d_in * 64 + 64 * 32 + 32 * 1),
        transcendentals=B,                              # one exp per sigmoid
        bytes_accessed=B * d_in * itemsize + weight_bytes + B * 4,
    )

    out = pl.pallas_call(
        _mlp_kernel,
        out_shape=jax.ShapeDtypeStruct((1, B), jnp.float32),
        grid_spec=pltpu.PrefetchScalarGridSpec(
            num_scalar_prefetch=0,
            grid=(n_tiles,),
            in_specs=in_specs,
            out_specs=out_spec,
        ),
        compiler_params=pltpu.CompilerParams(
            dimension_semantics=_batch_dim_semantics(n_tiles),
            vmem_limit_bytes=_vmem_limit_bytes(tb, d_in, itemsize),
        ),
        cost_estimate=cost,
    )(x, w1, b1, w2, b2, w3, b3)

    # (1, B) lane-dense row -> (B, 1) column.
    return out.reshape(B, 1)


def init_params(key, d_in):
    """torch.nn.Linear default init U(-1/sqrt(fan_in), +1/sqrt(fan_in)).

    Weights kept in torch's [out_features, in_features] layout, biases as
    [out_features, 1] columns, matching the transposed (batch-on-lanes) kernel.
    """
    def linear(key, fan_in, fan_out):
        kw, kb = jax.random.split(key)
        bound = 1.0 / jnp.sqrt(float(fan_in))
        w = jax.random.uniform(kw, (fan_out, fan_in), jnp.float32, -bound, bound)
        b = jax.random.uniform(kb, (fan_out, 1), jnp.float32, -bound, bound)
        return w, b

    k1, k2, k3 = jax.random.split(key, 3)
    w1, b1 = linear(k1, d_in, 64)
    w2, b2 = linear(k2, 64, 32)
    w3, b3 = linear(k3, 32, 1)
    return (w1, b1, w2, b2, w3, b3)


if __name__ == "__main__":
    key = jax.random.PRNGKey(0)
    kx, kp = jax.random.split(key)

    d_in = 32
    params = init_params(kp, d_in)
    w1, b1, w2, b2, w3, b3 = params

    def ref_forward(xv):
        h1 = jnp.maximum(xv @ w1.T + b1.T, 0.0)
        h2 = jnp.maximum(h1 @ w2.T + b2.T, 0.0)
        return jax.nn.sigmoid(h2 @ w3.T + b3.T)

    # Case 1: batch divisible by the tile (all full blocks), 3 grid steps.
    x1 = jax.random.normal(kx, (384, d_in), jnp.float32)
    out1 = jax.block_until_ready(plain_mlp_forward(x1, params, tb=128))
    assert out1.shape == (384, 1)
    assert bool(jnp.all((out1 >= 0.0) & (out1 <= 1.0)))
    assert bool(jnp.allclose(out1, ref_forward(x1), atol=1e-4, rtol=1e-4))

    # Case 2: ragged batch with auto tile selection; exercises the pad-free
    # partial-last-block path (no jnp.pad copy of x).
    x2 = jax.random.normal(jax.random.fold_in(kx, 1), (300, d_in), jnp.float32)
    out2 = jax.block_until_ready(plain_mlp_forward(x2, params))
    assert out2.shape == (300, 1)
    assert bool(jnp.all((out2 >= 0.0) & (out2 <= 1.0)))
    assert bool(jnp.allclose(out2, ref_forward(x2), atol=1e-4, rtol=1e-4))

    print("KERNEL_OK")
</pallas_src>

<mosaic_0001>
module attributes {stable_mosaic.version = 11 : i64} {
  func.func @_mlp_kernel(%arg0: i32, %arg1: memref<128x32xf32, #tpu.memory_space<vmem>>, %arg2: memref<64x32xf32, #tpu.memory_space<vmem>>, %arg3: memref<64x1xf32, #tpu.memory_space<vmem>>, %arg4: memref<32x64xf32, #tpu.memory_space<vmem>>, %arg5: memref<32x1xf32, #tpu.memory_space<vmem>>, %arg6: memref<1x32xf32, #tpu.memory_space<vmem>>, %arg7: memref<1x1xf32, #tpu.memory_space<vmem>>, %arg8: memref<1x128xf32, #tpu.memory_space<vmem>>) attributes {dimension_semantics = [#tpu.dimension_semantics<parallel>], iteration_bounds = array<i64: 3>, scalar_prefetch = 0 : i64, scratch_operands = 0 : i64, tpu.core_type = #tpu.core_type<tc>, window_params = [{transform_indices = @transform_0, window_bounds = array<i64: 128, 32>}, {pipeline_mode = #tpu.pipeline_mode<synchronous>, transform_indices = @transform_1, window_bounds = array<i64: 64, 32>}, {pipeline_mode = #tpu.pipeline_mode<synchronous>, transform_indices = @transform_2, window_bounds = array<i64: 64, 1>}, {pipeline_mode = #tpu.pipeline_mode<synchronous>, transform_indices = @transform_3, window_bounds = array<i64: 32, 64>}, {pipeline_mode = #tpu.pipeline_mode<synchronous>, transform_indices = @transform_4, window_bounds = array<i64: 32, 1>}, {pipeline_mode = #tpu.pipeline_mode<synchronous>, transform_indices = @transform_5, window_bounds = array<i64: 1, 32>}, {pipeline_mode = #tpu.pipeline_mode<synchronous>, transform_indices = @transform_6, window_bounds = array<i64: 1, 1>}, {transform_indices = @transform_7, window_bounds = array<i64: 1, 128>}]} {
    %c0 = arith.constant 0 : index
    %c0_0 = arith.constant 0 : index
    %0 = vector.load %arg1[%c0, %c0_0] : memref<128x32xf32, #tpu.memory_space<vmem>>, vector<128x32xf32>
    %c0_1 = arith.constant 0 : index
    %c0_2 = arith.constant 0 : index
    %1 = vector.load %arg2[%c0_1, %c0_2] : memref<64x32xf32, #tpu.memory_space<vmem>>, vector<64x32xf32>
    %cst = arith.constant dense<0.000000e+00> : vector<64x128xf32>
    %2 = tpu.matmul %1, %0, %cst {dimension_numbers = #tpu.dot_dimension_numbers<[1], [1], [0], [0], [0, 0, 1, 0], [], []>} : vector<64x32xf32>, vector<128x32xf32>, vector<64x128xf32> -> vector<64x128xf32>
    %c0_3 = arith.constant 0 : index
    %c0_4 = arith.constant 0 : index
    %3 = vector.load %arg3[%c0_3, %c0_4] : memref<64x1xf32, #tpu.memory_space<vmem>>, vector<64x1xf32>
    %4 = vector.broadcast %3 : vector<64x1xf32> to vector<64x128xf32>
    %5 = arith.addf %2, %4 : vector<64x128xf32>
    %cst_5 = arith.constant 0.000000e+00 : f32
    %6 = vector.broadcast %cst_5 : f32 to vector<64x128xf32>
    %7 = arith.maximumf %5, %6 : vector<64x128xf32>
    %c0_6 = arith.constant 0 : index
    %c0_7 = arith.constant 0 : index
    %8 = vector.load %arg4[%c0_6, %c0_7] : memref<32x64xf32, #tpu.memory_space<vmem>>, vector<32x64xf32>
    %cst_8 = arith.constant dense<0.000000e+00> : vector<32x128xf32>
    %9 = tpu.matmul %8, %7, %cst_8 {dimension_numbers = #tpu.dot_dimension_numbers<[1], [0], [0], [1], [0, 0, 1, 1], [], []>} : vector<32x64xf32>, vector<64x128xf32>, vector<32x128xf32> -> vector<32x128xf32>
    %c0_9 = arith.constant 0 : index
    %c0_10 = arith.constant 0 : index
    %10 = vector.load %arg5[%c0_9, %c0_10] : memref<32x1xf32, #tpu.memory_space<vmem>>, vector<32x1xf32>
    %11 = vector.broadcast %10 : vector<32x1xf32> to vector<32x128xf32>
    %12 = arith.addf %9, %11 : vector<32x128xf32>
    %cst_11 = arith.constant 0.000000e+00 : f32
    %13 = vector.broadcast %cst_11 : f32 to vector<32x128xf32>
    %14 = arith.maximumf %12, %13 : vector<32x128xf32>
    %c0_12 = arith.constant 0 : index
    %c0_13 = arith.constant 0 : index
    %15 = vector.load %arg6[%c0_12, %c0_13] : memref<1x32xf32, #tpu.memory_space<vmem>>, vector<1x32xf32>
    %cst_14 = arith.constant dense<0.000000e+00> : vector<1x128xf32>
    %16 = tpu.matmul %15, %14, %cst_14 {dimension_numbers = #tpu.dot_dimension_numbers<[1], [0], [0], [1], [0, 0, 1, 1], [], []>} : vector<1x32xf32>, vector<32x128xf32>, vector<1x128xf32> -> vector<1x128xf32>
    %c0_15 = arith.constant 0 : index
    %c0_16 = arith.constant 0 : index
    %17 = vector.load %arg7[%c0_15, %c0_16] : memref<1x1xf32, #tpu.memory_space<vmem>>, vector<1x1xf32>
    %18 = vector.broadcast %17 : vector<1x1xf32> to vector<1x128xf32>
    %19 = arith.addf %16, %18 : vector<1x128xf32>
    %20 = arith.negf %19 : vector<1x128xf32>
    %21 = math.exp %20 : vector<1x128xf32>
    %cst_17 = arith.constant 1.000000e+00 : f32
    %22 = vector.broadcast %cst_17 : f32 to vector<1x128xf32>
    %23 = arith.addf %22, %21 : vector<1x128xf32>
    %24 = arith.divf %22, %23 : vector<1x128xf32>
    %c0_18 = arith.constant 0 : index
    %c0_19 = arith.constant 0 : index
    %25 = vector.load %arg8[%c0_18, %c0_19] : memref<1x128xf32, #tpu.memory_space<vmem>>, vector<1x128xf32>
    tpu.vector_store %arg8[%c0_18, %c0_19], %24 {strides = array<i32>} : memref<1x128xf32, #tpu.memory_space<vmem>>, vector<1x128xf32>,
    return
  }
  func.func @transform_0(%arg0: i32) -> (i32, i32) {
    %c0_i32 = arith.constant 0 : i32
    %c0_i32_0 = arith.constant 0 : i32
    return %arg0, %c0_i32 : i32, i32
  }
  func.func @transform_1(%arg0: i32) -> (i32, i32) {
    %c0_i32 = arith.constant 0 : i32
    %c0_i32_0 = arith.constant 0 : i32
    %c0_i32_1 = arith.constant 0 : i32
    return %c0_i32, %c0_i32_0 : i32, i32
  }
  func.func @transform_2(%arg0: i32) -> (i32, i32) {
    %c0_i32 = arith.constant 0 : i32
    %c0_i32_0 = arith.constant 0 : i32
    %c0_i32_1 = arith.constant 0 : i32
    return %c0_i32, %c0_i32_0 : i32, i32
  }
  func.func @transform_3(%arg0: i32) -> (i32, i32) {
    %c0_i32 = arith.constant 0 : i32
    %c0_i32_0 = arith.constant 0 : i32
    %c0_i32_1 = arith.constant 0 : i32
    return %c0_i32, %c0_i32_0 : i32, i32
  }
  func.func @transform_4(%arg0: i32) -> (i32, i32) {
    %c0_i32 = arith.constant 0 : i32
    %c0_i32_0 = arith.constant 0 : i32
    %c0_i32_1 = arith.constant 0 : i32
    return %c0_i32, %c0_i32_0 : i32, i32
  }
  func.func @transform_5(%arg0: i32) -> (i32, i32) {
    %c0_i32 = arith.constant 0 : i32
    %c0_i32_0 = arith.constant 0 : i32
    %c0_i32_1 = arith.constant 0 : i32
    return %c0_i32, %c0_i32_0 : i32, i32
  }
  func.func @transform_6(%arg0: i32) -> (i32, i32) {
    %c0_i32 = arith.constant 0 : i32
    %c0_i32_0 = arith.constant 0 : i32
    %c0_i32_1 = arith.constant 0 : i32
    return %c0_i32, %c0_i32_0 : i32, i32
  }
  func.func @transform_7(%arg0: i32) -> (i32, i32) {
    %c0_i32 = arith.constant 0 : i32
    %c0_i32_0 = arith.constant 0 : i32
    return %c0_i32, %arg0 : i32, i32
  }
}

</mosaic_0001>

<bundles_post_ra>
// kernel: tpu_custom_call.1
= control target key start
LH: loop header
LB: loop body
LE: loop exit
PB: predicated region body
PF: predicated region fallthrough
CT: control target
= control target key end

     0   :  { %s1458_s0 = inlined_call_operand.vmem [shape: f32[384,32], index: 0, kind: input, shape index: {}]   ;;  %s1459_s1 = inlined_call_operand.vmem [shape: f32[64,32], index: 1, kind: input, shape index: {}]   ;;  %s1460_s2 = inlined_call_operand.vmem [shape: f32[64,1], index: 2, kind: input, shape index: {}]   ;;  %s1461_s3 = inlined_call_operand.vmem [shape: f32[32,64], index: 3, kind: input, shape index: {}]   ;;  %s1462_s4 = inlined_call_operand.vmem [shape: f32[32,1], index: 4, kind: input, shape index: {}]   ;;  %s1463_s5 = inlined_call_operand.vmem [shape: f32[1,32], index: 5, kind: input, shape index: {}]   ;;  %s1464_s6 = inlined_call_operand.<no memory space> [shape: f32[1,1], index: 6, kind: input, shape index: {}]   ;;  %s1465_s7 = inlined_call_operand.hbm [shape: f32[1,384], index: 7, kind: output, shape index: {}]  }
   0x1   :  { %v12_v0 = vstv %s1464_s6 }
   0x2   :  { %13 = vst [vmem:[#allocation2] sm:$0x1] %v12_v0 }
   0x3   :  { %14 = vsyncpa [#allocation4], 0 }
   0x4   :  { %16 = vsyncpa [#allocation4 + $0x1], 0  ;;  %s1215_s26 = smov 0   ;;  %s1217_s27 = smov 0  }
   0x5   :  { %s1219_s28 = smov 0   ;;  %s1221_s29 = smov 0  }
   0x6 LB: > { %s826_s6 = sadd.s32 4294967295, %s1165_s29   ;;  %s827_s30 = sadd.s32 4294967294, %s1165_s29   ;;  %s1165_s29 = sphi %s1221_s29, %s1473_s29   ;;  %s1161_s28 = sphi %s1219_s28, %s1472_s28   ;;  %s1157_s27 = sphi %s1217_s27, %s1471_s27   ;;  %s1153_s26 = sphi %s1215_s26, %s1470_s26  }
   0x7   : > { %s1238_s8 = sadd.s32 1, %s1165_s29   ;;  %s181_s9 = sadd.s32 1, %s1161_s28 }
   0x8   : > { %s178_s10 = ssub.s32 %s1165_s29, %s1238_s8  ;;  %p191_p0 = scmp.ne.s32.totalorder %s1161_s28, %s1157_s27 }
   0x9   : > { %p179_p1 = scmp.eq.s32.totalorder %s178_s10, 0  ;;  %p192_p2 = scmp.eq.s32.totalorder %s826_s6, 2 }
   0xa   : > { %p197_p3 = scmp.ne.s32.totalorder %s1157_s27, %s1153_s26  ;;  %p198_p4 = scmp.eq.s32.totalorder %s827_s30, 2 }
   0xb   : > { %s1248_s11 = scalar_select %p179_p1, %s1161_s28, %s181_s9  }
   0xc   : > { %p1250_p5 = por %p192_p2, %p191_p0  ;;  %p1254_p6 = por %p198_p4, %p197_p3 }
   0xd   : > { %p830_p7 = scmp.ge.s32.totalorder %s1165_s29, 1  ;;  %p243_p8 = scmp.lt.s32.totalorder %s1165_s29, 4 }
   0xf   : > { %p244_p9 = pnand %p830_p7, %p243_p8 }
  0x10   : > { %s1260_s14 = sshll.u32 (!%p244_p9), %s826_s6, 4  ;;  %vm352_vm0 = vcmask (!%p244_p9), 261120   ;;  %v296_v1 = vld [vmem:[%s1459_s1] sm:$0xff] (!%p244_p9)  ;;  %v1167_v2 = vmov (!%p244_p9), 0   ;;  %v306_v4 = vld [vmem:[%s1460_s2 + $0x10] sm:$0xff] (!%p244_p9)  ;;  %v305_v5 = vld [vmem:[%s1460_s2 + $0x8] sm:$0xff] (!%p244_p9) }
  0x11   : > { %247 = sbr.rel (%p244_p9) target bundleno = 810 (0x32a), region = 48  ;;  %p275_p10 = scmp.lt.s32.totalorder (!%p244_p9), %s1260_s14, 47  ;;  %939 = vmatprep.mubr.msk.f32.mxu0 (!%p244_p9), %vm352_vm0, %v296_v1  ;;  %1097 = vset.pattern.permute.xlu0 (!%p244_p9), %v1167_v2  ;;  %v304_v3 = vld [vmem:[%s1460_s2] sm:$0xff] (!%p244_p9)  ;;  %v307_v6 = vld [vmem:[%s1460_s2 + $0x18] sm:$0xff] (!%p244_p9)  ;;  %vm1287_vm1 = vmpackc.low (!%p244_p9), %vm352_vm0, %vm352_vm0  ;;  %vm566_vm2 = vcmask (!%p244_p9), 523264   ;;  %vm1169_vm3 = vmmov (!%p244_p9), 0  }
  0x12   : > { %1098 = vset.pattern.permute.xlu1 (!%p244_p9), %v1167_v2  ;;  %314 = vperm.xlu0 (!%p244_p9), %1097, %v304_v3   ;;  %v308_v14 = vld [vmem:[%s1460_s2 + $0x20] sm:$0xff] (!%p244_p9)  ;;  %v309_v15 = vld [vmem:[%s1460_s2 + $0x28] sm:$0xff] (!%p244_p9)  ;;  %v310_v18 = vld [vmem:[%s1460_s2 + $0x30] sm:$0xff] (!%p244_p9)  ;;  %s272_s25 = sand.u32 (!%p244_p9), 1, %s1157_s27   ;;  %s1416_s16 = scalar_lea.hbm (!%p244_p9), %s1465_s7, %s1260_s14 }
  0x13   : > { %324 = vperm.xlu1 (!%p244_p9), %1098, %v306_v4   ;;  %v311_v19 = vld [vmem:[%s1460_s2 + $0x38] sm:$0xff] (!%p244_p9)  ;;  %v542_v21 = vld [vmem:[%s1462_s4] sm:$0xff] (!%p244_p9)  ;;  %v543_v22 = vld [vmem:[%s1462_s4 + $0x8] sm:$0xff] (!%p244_p9)  ;;  %s273_s6 = scalar_lea.vmem (!%p244_p9), [#allocation3], %s272_s25  ;;  %s1171_s19 = smov (!%p244_p9), [#allocation3]  }
  0x14   : > { %v544_v25 = vld [vmem:[%s1462_s4 + $0x10] sm:$0xff] (!%p244_p9)  ;;  %v545_v26 = vld [vmem:[%s1462_s4 + $0x18] sm:$0xff] (!%p244_p9)  ;;  %v669_v28 = vld [vmem:[#allocation2] sm:$0x1] (!%p244_p9)  ;;  %s772_s30 = sshll.u32 (!%p244_p9), %s273_s6, 4  ;;  %s1107_s20 = sshll.u32 (!%p244_p9), %s1171_s19, 4  ;;  %s1418_s30 = int_to_ptr.vmem [resolvable:$true] %s772_s30  ;;  %s1108_s20 = int_to_ptr.vmem [resolvable:$false] %s1107_s20 }
  0x15   : > { %v297_v41 = vld [vmem:[%s1459_s1 + $0x8] sm:$0xff] (!%p244_p9)  ;;  %v298_v42 = vld [vmem:[%s1459_s1 + $0x10] sm:$0xff] (!%p244_p9)  ;;  %v299_v43 = vld [vmem:[%s1459_s1 + $0x18] sm:$0xff] (!%p244_p9)  ;;  %s1103_s18 = scalar_lea.vmem (!%p244_p9), %s1418_s30, 16  ;;  %p1110_p0 = scmp.lt.s32.totalorder (!%p244_p9), %s1418_s30, %s1108_s20 }
  0x16   : > { %319 = vperm.xlu0 (!%p244_p9), %1097, %v305_v5   ;;  %v300_v44 = vld [vmem:[%s1459_s1 + $0x20] sm:$0xff] (!%p244_p9)  ;;  %v301_v45 = vld [vmem:[%s1459_s1 + $0x28] sm:$0xff] (!%p244_p9)  ;;  %v302_v46 = vld [vmem:[%s1459_s1 + $0x30] sm:$0xff] (!%p244_p9)  ;;  %p1104_p11 = scmp.ne.s32.totalorder (!%p244_p9), %s1418_s30, %s1103_s18 }
  0x17   : > { %329 = vperm.xlu1 (!%p244_p9), %1098, %v307_v6   ;;  %v303_v47 = vld [vmem:[%s1459_s1 + $0x38] sm:$0xff] (!%p244_p9)  ;;  %v538_v48 = vld [vmem:[%s1461_s3] sm:$0xff] (!%p244_p9) }
  0x18   : > { %s276_s17 = scalar_select %p275_p10, %s1260_s14, 47  ;;  %967 = vmatprep.mubr.msk.f32.mxu1 %vm566_vm2, %v538_v48 }
  0x19   : > { %p1105_p12 = pnand %p1104_p11, %p1250_p5 }
  0x1a   : > { %s832_s22 = sshll.u32 %s276_s17, 3  ;;  %334 = vperm.xlu0 %1097, %v308_v14   ;;  %s760_s17 = scalar_lea.sflag [#allocation4], %s272_s25 }
  0x1b   : > { %s1283_s10 = scalar_lea.vmem %s1458_s0, %s832_s22  ;;  %339 = vperm.xlu1 %1098, %v309_v15   ;;  %p1106_p13 = pneg %p1105_p12 }
  0x1c   : > { %v280_v8 = vld [vmem:[%s1283_s10] sm:$0xff]  ;;  %v281_v9 = vld [vmem:[%s1283_s10 + $0x8] sm:$0xff]  ;;  %v282_v10 = vld [vmem:[%s1283_s10 + $0x10] sm:$0xff] }
  0x1d   : > { %v984_v11 = vpack.c.bf16 %v281_v9, %v280_v8  ;;  %v283_v12 = vld [vmem:[%s1283_s10 + $0x18] sm:$0xff]  ;;  %v284_v16 = vld [vmem:[%s1283_s10 + $0x20] sm:$0xff]  ;;  %v285_v17 = vld [vmem:[%s1283_s10 + $0x28] sm:$0xff] }
  0x1e   : > { %v990_v13 = vpack.c.bf16 %v283_v12, %v282_v10  ;;  %v996_v20 = vpack.c.bf16 %v285_v17, %v284_v16  ;;  %344 = vperm.xlu0 %1097, %v310_v18   ;;  %v286_v23 = vld [vmem:[%s1283_s10 + $0x30] sm:$0xff]  ;;  %v287_v24 = vld [vmem:[%s1283_s10 + $0x38] sm:$0xff]  ;;  %v288_v29 = vld [vmem:[%s1283_s10 + $0x40] sm:$0xff] }
  0x1f   : > { %986 = vmatprep.subr.msk.bf16.mxu0 %vm1287_vm1, %v984_v11  ;;  %349 = vperm.xlu1 %1098, %v311_v19   ;;  %v1002_v27 = vpack.c.bf16 %v287_v24, %v286_v23  ;;  %v289_v30 = vld [vmem:[%s1283_s10 + $0x48] sm:$0xff]  ;;  %v290_v32 = vld [vmem:[%s1283_s10 + $0x50] sm:$0xff]  ;;  %v291_v33 = vld [vmem:[%s1283_s10 + $0x58] sm:$0xff]  ;;  %v1168_v24 = vmov 0.0|0.0  }
  0x20   : > { %989 = vmatpush3.bf16.xpose.msk.msra.mxu0 %vm1287_vm1, %v984_v11  ;;  %v1008_v31 = vpack.c.bf16 %v289_v30, %v288_v29  ;;  %v1014_v34 = vpack.c.bf16 %v291_v33, %v290_v32  ;;  %v292_v35 = vld [vmem:[%s1283_s10 + $0x60] sm:$0xff]  ;;  %v293_v36 = vld [vmem:[%s1283_s10 + $0x68] sm:$0xff]  ;;  %v294_v38 = vld [vmem:[%s1283_s10 + $0x70] sm:$0xff] }
  0x21   : > { %992 = vmatprep.subr.msk.bf16.mxu0 %vm1287_vm1, %v990_v13  ;;  %v1020_v37 = vpack.c.bf16 %v293_v36, %v292_v35  ;;  %v295_v39 = vld [vmem:[%s1283_s10 + $0x78] sm:$0xff]  ;;  %s1109_s10 = scalar_lea.vmem %s1108_s20, 32 }
  0x22   : > { %548 = vperm.xlu0 %1097, %v542_v21   ;;  %v1026_v40 = vpack.c.bf16 %v295_v39, %v294_v38  ;;  %v539_v21 = vld [vmem:[%s1461_s3 + $0x8] sm:$0xff]  ;;  %v541_v23 = vld [vmem:[%s1461_s3 + $0x18] sm:$0xff]  ;;  %p1111_p1 = scmp.lt.s32.totalorder %s1109_s10, %s1103_s18 }
  0x23   : > { %553 = vperm.xlu1 %1098, %v543_v22   ;;  %v540_v22 = vld [vmem:[%s1461_s3 + $0x10] sm:$0xff] }
  0x24   : > { %p1112_p2 = por %p1111_p1, %p1110_p0 }
  0x26   : > { %558 = vperm.xlu0 %1097, %v544_v25   ;;  %v1170_v25 = vmov 0.0   ;;  %p1113_p3 = pnand %p1112_p2, %p1106_p13 }
  0x27   : > { %563 = vperm.xlu1 %1098, %v545_v26  }
  0x28   : > { %995 = vmatpush3.bf16.xpose.msk.msra.mxu0 %vm1287_vm1, %v990_v13 }
  0x29   : > { %998 = vmatprep.subr.msk.bf16.mxu0 %vm1287_vm1, %v996_v20 }
  0x2a   : > { %672 = vperm.xlu0 %1097, %v669_v28  }
  0x30   : > { %1001 = vmatpush3.bf16.xpose.msk.msra.mxu0 %vm1287_vm1, %v996_v20 }
  0x31   : > { %1004 = vmatprep.subr.msk.bf16.mxu0 %vm1287_vm1, %v1002_v27 }
  0x38   : > { %1007 = vmatpush3.bf16.xpose.msk.msra.mxu0 %vm1287_vm1, %v1002_v27 }
  0x39   : > { %1010 = vmatprep.subr.msk.bf16.mxu0 %vm1287_vm1, %v1008_v31 }
  0x40   : > { %1013 = vmatpush3.bf16.xpose.msk.msra.mxu0 %vm1287_vm1, %v1008_v31 }
  0x41   : > { %1016 = vmatprep.subr.msk.bf16.mxu0 %vm1287_vm1, %v1014_v34 }
  0x48   : > { %1019 = vmatpush3.bf16.xpose.msk.msra.mxu0 %vm1287_vm1, %v1014_v34 }
  0x49   : > { %1022 = vmatprep.subr.msk.bf16.mxu0 %vm1287_vm1, %v1020_v37 }
  0x50   : > { %1025 = vmatpush3.bf16.xpose.msk.msra.mxu0 %vm1287_vm1, %v1020_v37 }
  0x51   : > { %1028 = vmatprep.subr.msk.bf16.mxu0 %vm1287_vm1, %v1026_v40 }
  0x58   : > { %1031 = vmatpush3.bf16.xpose.msk.msra.mxu0 %vm1287_vm1, %v1026_v40 }
  0x5f   : > { %940 = vmatmul.mubr.msk.f32.vlgmr.msra.gmra.mrb[0].mxu0 %vm352_vm0, %v297_v41 }
  0x60   : > { %942 = vmatprep.mubr.msk.f32.mxu0 %vm352_vm0, %v298_v42 }
  0x63   : > { %943 = vmatmul.mubr.msk.f32.gmra.mrb[2].mxu0 %vm352_vm0, %v299_v43 }
  0x64   : > { %945 = vmatprep.mubr.msk.f32.mxu0 %vm352_vm0, %v300_v44  ;;  %v668_v44 = vld [vmem:[%s1463_s5] sm:$0x1] }
  0x67   : > { %946 = vmatmul.mubr.msk.f32.gmra.mrb[4].mxu0 %vm352_vm0, %v301_v45  ;;  %v675_v45 = vlaneseq }
  0x68   : > { %948 = vmatprep.mubr.msk.f32.mxu0 %vm352_vm0, %v302_v46 }
  0x69   : > { %v676_v46 = vshrl.u32 %v675_v45, 7 }
  0x6b   : > { %949 = vmatmul.mubr.msk.f32.gmra.mrb[6].mxu0 %vm352_vm0, %v303_v47  ;;  %v677_v47 = vsub.s32 0, %v676_v46 }
  0x91   : > { %v315_v49 = vpop.permute.xlu0 %314 }
  0x92   : > { %v325_v50 = vpop.permute.xlu1 %324 }
  0x95   : > { %v320_v51 = vpop.permute.xlu0 %319 }
  0x96   : > { %v330_v52 = vpop.permute.xlu1 %329 }
  0x99   : > { %v335_v1 = vpop.permute.xlu0 %334 }
  0x9a   : > { %v340_v62 = vpop.permute.xlu1 %339 }
  0x9d   : > { %v345_v13 = vpop.permute.xlu0 %344 }
  0x9e   : > { %v350_v10 = vpop.permute.xlu1 %349 }
  0xa1   : > { %v549_v27 = vpop.permute.xlu0 %548 }
  0xa2   : > { %v554_v26 = vpop.permute.xlu1 %553 }
  0xa5   : > { %v559_v36 = vpop.permute.xlu0 %558 }
  0xa6   : > { %v564_v33 = vpop.permute.xlu1 %563 }
  0xa9   : > { %v673_v48 = vpop.permute.xlu0 %672 }
 0x132   : > { %v941_v53 = vpop.f32.mrb[0].mxu0 }
 0x133   : > { %v497_v54 = vadd.f32 %v941_v53, %v320_v51  ;;  %v491_v55 = vpop.f32.mrb[1].mxu0 }
 0x134   : > { %v492_v56 = vadd.f32 %v491_v55, %v315_v49  ;;  %v678_v49 = vrot.slane %v673_v48, %v677_v47 }
 0x135   : > { %v531_v57 = vmax.f32 %v497_v54, 0.0 }
 0x136   : > { %v530_v58 = vmax.f32 %v492_v56, 0.0  ;;  %v944_v59 = vpop.f32.mrb[2].mxu0 }
 0x137   : > { %v507_v60 = vadd.f32 %v944_v59, %v330_v52  ;;  %v501_v61 = vpop.f32.mrb[3].mxu0 }
 0x138   : > { %v502_v63 = vadd.f32 %v501_v61, %v325_v50  ;;  %v1032_v0 = vpack.c.bf16 %v531_v57, %v530_v58 }
 0x139   : > { %v533_v2 = vmax.f32 %v507_v60, 0.0 }
 0x13a   : > { %v532_v3 = vmax.f32 %v502_v63, 0.0  ;;  %v947_v4 = vpop.f32.mrb[4].mxu0  ;;  %1033 = vmatprep.subr.bf16.mxu1 %v1032_v0 }
 0x13b   : > { %v517_v5 = vadd.f32 %v947_v4, %v340_v62  ;;  %v511_v6 = vpop.f32.mrb[5].mxu0  ;;  %1035 = vmatpush3.bf16.msra.mxu1 %v1032_v0 }
 0x13c   : > { %v1036_v7 = vpack.c.bf16 %v533_v2, %v532_v3  ;;  %v512_v8 = vadd.f32 %v511_v6, %v335_v1 }
 0x13d   : > { %v535_v9 = vmax.f32 %v517_v5, 0.0 }
 0x13e   : > { %v534_v11 = vmax.f32 %v512_v8, 0.0  ;;  %v950_v12 = vpop.f32.mrb[6].mxu0  ;;  %1037 = vmatprep.subr.bf16.mxu1 %v1036_v7 }
 0x13f   : > { %v527_v14 = vadd.f32 %v950_v12, %v350_v10  ;;  %v521_v15 = vpop.f32.mrb[7].mxu0  ;;  %1039 = vmatpush3.bf16.msra.mxu1 %v1036_v7 }
 0x140   : > { %v1040_v16 = vpack.c.bf16 %v535_v9, %v534_v11  ;;  %v522_v17 = vadd.f32 %v521_v15, %v345_v13 }
 0x141   : > { %v537_v18 = vmax.f32 %v527_v14, 0.0 }
 0x142   : > { %v536_v19 = vmax.f32 %v522_v17, 0.0  ;;  %1041 = vmatprep.subr.bf16.mxu1 %v1040_v16 }
 0x143   : > { %1043 = vmatpush3.bf16.msra.mxu1 %v1040_v16 }
 0x144   : > { %v1044_v20 = vpack.c.bf16 %v537_v18, %v536_v19 }
 0x146   : > { %1045 = vmatprep.subr.bf16.mxu1 %v1044_v20 }
 0x147   : > { %1047 = vmatpush3.bf16.msra.mxu1 %v1044_v20 }
 0x148   : > { %1048 = vmatprep.subr.bf16.mxu1 %v1168_v24 }
 0x14a   : > { %968 = vmatmul.mubr.msk.f32.vlgmr.msra.gmra.mrb[0].mxu1 %vm566_vm2, %v539_v21 }
 0x14b   : > { %970 = vmatprep.mubr.msk.f32.mxu1 %vm566_vm2, %v540_v22 }
 0x14e   : > { %971 = vmatmul.mubr.msk.f32.gmra.mrb[2].mxu1 %vm566_vm2, %v541_v23 }
 0x14f   : > { %981 = vmatprep.mubr.msk.f32.mxu1 %vm1169_vm3, %v1170_v25 }
 0x21d   : > { %v969_v28 = vpop.f32.mrb[0].mxu1 }
 0x21e   : > { %v651_v29 = vadd.f32 %v969_v28, %v554_v26  ;;  %v645_v30 = vpop.f32.mrb[1].mxu1 }
 0x21f   : > { %v646_v31 = vadd.f32 %v645_v30, %v549_v27 }
 0x220   : > { %v665_v32 = vmax.f32 %v651_v29, 0.0 }
 0x221   : > { %v664_v34 = vmax.f32 %v646_v31, 0.0  ;;  %v972_v35 = vpop.f32.mrb[2].mxu1 }
 0x222   : > { %v661_v37 = vadd.f32 %v972_v35, %v564_v33  ;;  %v655_v38 = vpop.f32.mrb[3].mxu1 }
 0x223   : > { %v1049_v39 = vpack.c.bf16 %v665_v32, %v664_v34  ;;  %v656_v40 = vadd.f32 %v655_v38, %v559_v36 }
 0x224   : > { %v667_v41 = vmax.f32 %v661_v37, 0.0 }
 0x225   : > { %v666_v42 = vmax.f32 %v656_v40, 0.0  ;;  %1050 = vmatpush3.bf16.msra.mxu1 %v1049_v39 }
 0x226   : > { %1051 = vmatprep.subr.bf16.mxu1 %v1168_v24 }
 0x227   : > { %v1052_v43 = vpack.c.bf16 %v667_v41, %v666_v42 }
 0x229   : > { %1053 = vmatpush3.bf16.msra.mxu1 %v1052_v43 }
 0x22c   : > { %982 = vmatmul.mubr.msk.f32.vlgmr.msra.gmra.mrb[4].mxu1 %vm352_vm0, %v668_v44 }
 0x2ff   : > { %v748_v50 = vpop.f32.mrb[4].mxu1 }
 0x300   : > { %v749_v51 = vadd.f32 %v748_v50, %v678_v49  ;;  %v983_v52 = vpop.f32.mrb[5].mxu1 }
 0x302   : > { %v862_v53 = vmul.f32 -1.442695, %v749_v51 }
 0x304   : > { %1099 = vpow2.f32 %v862_v53 }
 0x30e   : > { %v1100_v54 = vpop.eup %1099 }
 0x30f   : > { %v755_v55 = vadd.f32 1.0, %v1100_v54 }
 0x311   : > { %1101 = vrcp.f32 %v755_v55 }
 0x31b   : > { %v1102_v56 = vpop.eup %1101 }
 0x31c   : > { %758 = vst [vmem:[%s273_s6] sm:$0x1] %v1102_v56 }
 0x31d   : > { %1116 = shalt.err (!%p1113_p3)
}
 0x31e   : > { %s1117_s14 = scalar_lea.hbm %s1416_s16, 16  ;;  %s1121_s23 = scalar_lea.hbm %s1465_s7, 48 }
 0x31f   : > { %p1118_p4 = scmp.ne.s32.totalorder %s1416_s16, %s1117_s14  ;;  %p1122_p9 = scmp.lt.u32.totalorder %s1416_s16, %s1465_s7 }
 0x320   : > { %p1123_p10 = scmp.lt.u32.totalorder %s1121_s23, %s1117_s14  ;;  %p1125_p12 = scmp.lt.u32.totalorder %s1117_s14, %s1416_s16 }
 0x321   : > { %p1119_p7 = pnand %p1118_p4, %p1250_p5 }
 0x322   : > { %p1124_p11 = por %p1123_p10, %p1122_p9 }
 0x323   : > { %p1120_p8 = pneg %p1119_p7 }
 0x324   : > { %p1126_p13 = por %p1125_p12, %p1124_p11 }
 0x326   : > { %p1127_p0 = pnand %p1126_p13, %p1120_p8 }
 0x328   : > { %1130 = shalt.err (!%p1127_p0)
}
 0x329   : > { %1054 = dma.vmem_to_hbm [thread:$0]  (%p1250_p5), %s1418_s30, 16, %s1416_s16, %s760_s17  }
 0x32a PF: > { %p1060_p1 = scmp.ge.s32.totalorder %s1165_s29, 2  ;;  %s784_s6 = sand.u32 1, %s1153_s26  }
 0x32b   : > { %s785_s9 = scalar_lea.sflag [#allocation4], %s784_s6 }
 0x32c   : > { %p1057_p2 = pnand %p1060_p1, %p1254_p6 }
 0x32e   : > { %1148 = dma.done.wait (!%p1057_p2), %s785_s9, 16  }
 0x32f   : > { %1150 = vsyncadd (!%p1057_p2), %s785_s9, 4294967280  ;;  %p19_p3 = scmp.ge.s32.totalorder %s1238_s8, 5   ;;  %s1470_s26 = smov %s1157_s27 }
 0x330   : > { %s1471_s27 = smov %s1161_s28  ;;  %s1472_s28 = smov %s1248_s11 }
 0x331   : > { %s1473_s29 = smov %s1238_s8  ;;  %21 = sbr.rel (!%p19_p3) target bundleno = 6 (0x6), region = 83 }
 0x338   :  { %789 = vsyncpa [#allocation4], 1 }
 0x339   :  { %791 = vsyncpa [#allocation4 + $0x1], 1 }

</bundles_post_ra>
